<compile_context>
chip_gen: v7x
topology: tpu7x:2x2x1
jax: 0.10.0
libtpu: 0.0.40
codegen_flags: <defaults>
</compile_context>

<pallas_src>
import jax
import jax.numpy as jnp
from jax.experimental import pallas as pl
from jax.experimental.pallas import tpu as pltpu


def _round_up(n: int, m: int) -> int:
    return ((n + m - 1) // m) * m


def _mlp_kernel(x_ref, w1_ref, b1_ref, w2_ref, b2_ref, o_ref):
    # hidden = relu(x @ W1 + b1) -- bf16 MXU operands, f32 accumulation.
    h = jnp.dot(x_ref[...], w1_ref[...], preferred_element_type=jnp.float32)
    h = jnp.maximum(h + b1_ref[...], 0.0)            # bias add + ReLU in f32
    # out = hidden @ W2 + b2
    o = jnp.dot(h.astype(jnp.bfloat16), w2_ref[...], preferred_element_type=jnp.float32)
    o_ref[...] = (o + b2_ref[...]).astype(o_ref.dtype)


def init_mlp_params(key, in_features, hidden_size, action_size, dtype=jnp.float32):
    """Mimics nn.Linear's uniform(-1/sqrt(fan_in), 1/sqrt(fan_in)) init.
    Weights returned pre-transposed to (in, out) for the kernel."""
    k1, k2, k3, k4 = jax.random.split(key, 4)
    bound1 = 1.0 / jnp.sqrt(in_features)
    bound2 = 1.0 / jnp.sqrt(hidden_size)
    w1 = jax.random.uniform(k1, (in_features, hidden_size), dtype, -bound1, bound1)
    b1 = jax.random.uniform(k2, (hidden_size,), dtype, -bound1, bound1)
    w2 = jax.random.uniform(k3, (hidden_size, action_size), dtype, -bound2, bound2)
    b2 = jax.random.uniform(k4, (action_size,), dtype, -bound2, bound2)
    return w1, b1, w2, b2


def pad_and_cast_params(w1, b1, w2, b2):
    """One-time prep: cast weights to bf16 (halves weight DMA bytes).
    Hidden dim stays UNPADDED (block shape == full dim is legal; padding it 32->128
    would 4x the W1 HBM bytes, the dominant DMA term at small batch).  Only the
    action dim is zero-padded to a multiple of 128 for a lane-dense output store."""
    D, H = w1.shape
    A = w2.shape[1]
    Ap = _round_up(A, 128)
    w1p = w1.astype(jnp.bfloat16)                                        # (D, H)
    b1p = b1.reshape(1, H).astype(jnp.float32)                           # (1, H)
    w2p = jnp.pad(w2, ((0, 0), (0, Ap - A))).astype(jnp.bfloat16)        # (H, Ap)
    b2p = jnp.pad(b2, ((0, Ap - A),)).reshape(1, Ap).astype(jnp.float32) # (1, Ap)
    return (w1p, b1p, w2p, b2p)


def mlp_forward(x, padded_params, action_size):
    """x: (B, D) -- ideally already bf16 from the producer; padded_params from
    pad_and_cast_params.  Returns f32 (B, action_size)."""
    w1p, b1p, w2p, b2p = padded_params
    if x.dtype != jnp.bfloat16:
        # Fallback cast; producers should hand us bf16 directly to avoid this pass.
        x = x.astype(jnp.bfloat16)
    B, D = x.shape
    H = w1p.shape[1]
    Ap = w2p.shape[1]

    # Batch tile: multiple of 16 sublanes (bf16 packs 16 rows/vreg).
    #  - large B: TM=256 fills the 256-wide MXU (v6e/v7x) and amortizes grid-step
    #    overhead; x double-buffer at TM=256, D=1024 is only ~1 MiB of VMEM.
    #  - small B: one just-big-enough tile so remainders never cost a dead tile.
    if B <= 256:
        TM = _round_up(max(B, 1), 16)
    else:
        TM = 256
    grid_m = pl.cdiv(B, TM)
    Bp = grid_m * TM
    if Bp != B:
        x = jnp.pad(x, ((0, Bp - B), (0, 0)))   # padded rows produce junk, sliced off below

    out_padded = pl.pallas_call(
        _mlp_kernel,
        out_shape=jax.ShapeDtypeStruct((Bp, Ap), jnp.float32),
        grid_spec=pl.GridSpec(
            grid=(grid_m,),
            in_specs=[
                pl.BlockSpec((TM, D), lambda i: (i, 0)),   # x: streamed along batch
                pl.BlockSpec((D, H), lambda i: (0, 0)),    # W1: VMEM-resident (H == full dim)
                pl.BlockSpec((1, H), lambda i: (0, 0)),    # b1: resident
                pl.BlockSpec((H, Ap), lambda i: (0, 0)),   # W2: resident
                pl.BlockSpec((1, Ap), lambda i: (0, 0)),   # b2: resident
            ],
            out_specs=pl.BlockSpec((TM, Ap), lambda i: (i, 0)),
        ),
        compiler_params=pltpu.CompilerParams(
            # Only shards across v7x's two TensorCores when grid_m >= 2, and a
            # mem-bound kernel sharing one HBM gets < 2x even then; harmless hint.
            dimension_semantics=("parallel",)),
    )(x, w1p, b1p, w2p, b2p)

    # TODO(synk): downstream consumers that can take the padded (Bp, Ap) slab directly
    # (masking rows >= B) would skip this extra XLA slice pass.
    return out_padded[:B, :action_size]


if __name__ == "__main__":
    # Small shapes consistent with the module: image (C=4, H=16, W=16),
    # hidden=32, action_size=8, batch=2.
    C, H, W = 4, 16, 16
    hidden_size = 32
    action_size = 8
    batch = 2
    in_features = C * H * W  # 1024

    key = jax.random.PRNGKey(0)
    kx, kp = jax.random.split(key)
    x_img = jax.random.normal(kx, (batch, C, H, W), jnp.float32)
    # Flatten as nn.Linear(C*H*W, ...) expects; producer supplies bf16 activations.
    x = x_img.reshape(batch, in_features).astype(jnp.bfloat16)

    w1, b1, w2, b2 = init_mlp_params(kp, in_features, hidden_size, action_size)
    padded_params = pad_and_cast_params(w1, b1, w2, b2)

    out = mlp_forward(x, padded_params, action_size)
    out = jax.block_until_ready(out)
    assert out.shape == (batch, action_size)
    assert out.dtype == jnp.float32

    # Pure-JAX reference applying the same bf16 quantization (x, W1, hidden, W2)
    # as the kernel path.  NOTE: this validates the kernel against its declared
    # precision contract, not against a pure-f32 PyTorch MLP.
    x_q = x.astype(jnp.float32)
    w1_q = w1.astype(jnp.bfloat16).astype(jnp.float32)
    w2_q = w2.astype(jnp.bfloat16).astype(jnp.float32)
    h_ref = jnp.maximum(x_q @ w1_q + b1, 0.0)
    h_ref = h_ref.astype(jnp.bfloat16).astype(jnp.float32)
    ref = h_ref @ w2_q + b2
    assert jnp.allclose(out, ref, atol=2e-3, rtol=2e-3), (out, ref)

    print("KERNEL_OK")
</pallas_src>

<mosaic_0001>
module attributes {stable_mosaic.version = 11 : i64} {
  func.func @_mlp_kernel(%arg0: i32, %arg1: memref<16x1024xbf16, #tpu.memory_space<vmem>>, %arg2: memref<1024x32xbf16, #tpu.memory_space<vmem>>, %arg3: memref<1x32xf32, #tpu.memory_space<vmem>>, %arg4: memref<32x128xbf16, #tpu.memory_space<vmem>>, %arg5: memref<1x128xf32, #tpu.memory_space<vmem>>, %arg6: memref<16x128xf32, #tpu.memory_space<vmem>>) attributes {dimension_semantics = [#tpu.dimension_semantics<parallel>], iteration_bounds = array<i64: 1>, scalar_prefetch = 0 : i64, scratch_operands = 0 : i64, tpu.core_type = #tpu.core_type<tc>, window_params = [{transform_indices = @transform_0, window_bounds = array<i64: 16, 1024>}, {pipeline_mode = #tpu.pipeline_mode<synchronous>, transform_indices = @transform_1, window_bounds = array<i64: 1024, 32>}, {pipeline_mode = #tpu.pipeline_mode<synchronous>, transform_indices = @transform_2, window_bounds = array<i64: 1, 32>}, {pipeline_mode = #tpu.pipeline_mode<synchronous>, transform_indices = @transform_3, window_bounds = array<i64: 32, 128>}, {pipeline_mode = #tpu.pipeline_mode<synchronous>, transform_indices = @transform_4, window_bounds = array<i64: 1, 128>}, {transform_indices = @transform_5, window_bounds = array<i64: 16, 128>}]} {
    %c0 = arith.constant 0 : index
    %c0_0 = arith.constant 0 : index
    %0 = vector.load %arg1[%c0, %c0_0] : memref<16x1024xbf16, #tpu.memory_space<vmem>>, vector<16x1024xbf16>
    %c0_1 = arith.constant 0 : index
    %c0_2 = arith.constant 0 : index
    %1 = vector.load %arg2[%c0_1, %c0_2] : memref<1024x32xbf16, #tpu.memory_space<vmem>>, vector<1024x32xbf16>
    %cst = arith.constant dense<0.000000e+00> : vector<16x32xf32>
    %2 = tpu.matmul %0, %1, %cst {dimension_numbers = #tpu.dot_dimension_numbers<[1], [0], [0], [1], [0, 0, 1, 1], [], []>} : vector<16x1024xbf16>, vector<1024x32xbf16>, vector<16x32xf32> -> vector<16x32xf32>
    %c0_3 = arith.constant 0 : index
    %c0_4 = arith.constant 0 : index
    %3 = vector.load %arg3[%c0_3, %c0_4] : memref<1x32xf32, #tpu.memory_space<vmem>>, vector<1x32xf32>
    %4 = vector.broadcast %3 : vector<1x32xf32> to vector<16x32xf32>
    %5 = arith.addf %2, %4 : vector<16x32xf32>
    %cst_5 = arith.constant 0.000000e+00 : f32
    %6 = vector.broadcast %cst_5 : f32 to vector<16x32xf32>
    %7 = arith.maximumf %5, %6 : vector<16x32xf32>
    %8 = arith.truncf %7 : vector<16x32xf32> to vector<16x32xbf16>
    %c0_6 = arith.constant 0 : index
    %c0_7 = arith.constant 0 : index
    %9 = vector.load %arg4[%c0_6, %c0_7] : memref<32x128xbf16, #tpu.memory_space<vmem>>, vector<32x128xbf16>
    %cst_8 = arith.constant dense<0.000000e+00> : vector<16x128xf32>
    %10 = tpu.matmul %8, %9, %cst_8 {dimension_numbers = #tpu.dot_dimension_numbers<[1], [0], [0], [1], [0, 0, 1, 1], [], []>} : vector<16x32xbf16>, vector<32x128xbf16>, vector<16x128xf32> -> vector<16x128xf32>
    %c0_9 = arith.constant 0 : index
    %c0_10 = arith.constant 0 : index
    %11 = vector.load %arg5[%c0_9, %c0_10] : memref<1x128xf32, #tpu.memory_space<vmem>>, vector<1x128xf32>
    %12 = vector.broadcast %11 : vector<1x128xf32> to vector<16x128xf32>
    %13 = arith.addf %10, %12 : vector<16x128xf32>
    %c0_11 = arith.constant 0 : index
    %c0_12 = arith.constant 0 : index
    %14 = vector.load %arg6[%c0_11, %c0_12] : memref<16x128xf32, #tpu.memory_space<vmem>>, vector<16x128xf32>
    tpu.vector_store %arg6[%c0_11, %c0_12], %13 {strides = array<i32>} : memref<16x128xf32, #tpu.memory_space<vmem>>, vector<16x128xf32>,
    return
  }
  func.func @transform_0(%arg0: i32) -> (i32, i32) {
    %c0_i32 = arith.constant 0 : i32
    %c0_i32_0 = arith.constant 0 : i32
    return %arg0, %c0_i32 : i32, i32
  }
  func.func @transform_1(%arg0: i32) -> (i32, i32) {
    %c0_i32 = arith.constant 0 : i32
    %c0_i32_0 = arith.constant 0 : i32
    %c0_i32_1 = arith.constant 0 : i32
    return %c0_i32, %c0_i32_0 : i32, i32
  }
  func.func @transform_2(%arg0: i32) -> (i32, i32) {
    %c0_i32 = arith.constant 0 : i32
    %c0_i32_0 = arith.constant 0 : i32
    %c0_i32_1 = arith.constant 0 : i32
    return %c0_i32, %c0_i32_0 : i32, i32
  }
  func.func @transform_3(%arg0: i32) -> (i32, i32) {
    %c0_i32 = arith.constant 0 : i32
    %c0_i32_0 = arith.constant 0 : i32
    %c0_i32_1 = arith.constant 0 : i32
    return %c0_i32, %c0_i32_0 : i32, i32
  }
  func.func @transform_4(%arg0: i32) -> (i32, i32) {
    %c0_i32 = arith.constant 0 : i32
    %c0_i32_0 = arith.constant 0 : i32
    %c0_i32_1 = arith.constant 0 : i32
    return %c0_i32, %c0_i32_0 : i32, i32
  }
  func.func @transform_5(%arg0: i32) -> (i32, i32) {
    %c0_i32 = arith.constant 0 : i32
    %c0_i32_0 = arith.constant 0 : i32
    return %arg0, %c0_i32 : i32, i32
  }
}

</mosaic_0001>

<bundles_post_ra>
// kernel: tpu_custom_call.1
= control target key start
LH: loop header
LB: loop body
LE: loop exit
PB: predicated region body
PF: predicated region fallthrough
CT: control target
= control target key end

     0   :  { %s1388_s0 = inlined_call_operand.vmem [shape: bf16[16,1024], index: 0, kind: input, shape index: {}]   ;;  %s1389_s1 = inlined_call_operand.vmem [shape: bf16[1024,32], index: 1, kind: input, shape index: {}]   ;;  %s1390_s2 = inlined_call_operand.vmem [shape: f32[1,32], index: 2, kind: input, shape index: {}]   ;;  %s1391_s3 = inlined_call_operand.vmem [shape: bf16[32,128], index: 3, kind: input, shape index: {}]   ;;  %s1392_s4 = inlined_call_operand.vmem [shape: f32[1,128], index: 4, kind: input, shape index: {}]   ;;  %s1393_s5 = inlined_call_operand.hbm [shape: f32[16,128], index: 5, kind: output, shape index: {}]  }
   0x1   :  { %v1023_v0 = vld [vmem:[%s1389_s1 + $0x40] sm:$0xff]   ;;  %v1027_v4 = vld [vmem:[%s1389_s1 + $0x48] sm:$0xff]   ;;  %v1031_v8 = vld [vmem:[%s1389_s1 + $0x50] sm:$0xff]  }
   0x2   :  { %v1024_v1 = vld [vmem:[%s1389_s1 + $0xc0] sm:$0xff]   ;;  %919 = vmatprep.subr.bf16.mxu0 %v1023_v0  ;;  %v1028_v5 = vld [vmem:[%s1389_s1 + $0xc8] sm:$0xff]   ;;  %v1032_v9 = vld [vmem:[%s1389_s1 + $0xd0] sm:$0xff]  }
   0x3   :  { %v1025_v2 = vld [vmem:[%s1389_s1] sm:$0xff]   ;;  %941 = vmatprep.subr.bf16.mxu1 %v1024_v1  ;;  %v1029_v6 = vld [vmem:[%s1389_s1 + $0x8] sm:$0xff]   ;;  %v1033_v10 = vld [vmem:[%s1389_s1 + $0x10] sm:$0xff]  }
   0x4   :  { %v1026_v3 = vld [vmem:[%s1389_s1 + $0x80] sm:$0xff]   ;;  %920 = vmatpush3.bf16.msra.mxu0 %v1025_v2  ;;  %v1030_v7 = vld [vmem:[%s1389_s1 + $0x88] sm:$0xff]   ;;  %v1034_v11 = vld [vmem:[%s1389_s1 + $0x90] sm:$0xff]  }
   0x5   :  { %942 = vmatpush3.bf16.msra.mxu1 %v1026_v3  ;;  %921 = vmatprep.subr.bf16.mxu0 %v1027_v4  ;;  %v1035_v12 = vld [vmem:[%s1389_s1 + $0x58] sm:$0xff]   ;;  %v1039_v16 = vld [vmem:[%s1389_s1 + $0x60] sm:$0xff]   ;;  %v1043_v20 = vld [vmem:[%s1389_s1 + $0x68] sm:$0xff]  }
   0x6   :  { %943 = vmatprep.subr.bf16.mxu1 %v1028_v5  ;;  %v1036_v13 = vld [vmem:[%s1389_s1 + $0xd8] sm:$0xff]   ;;  %v1040_v17 = vld [vmem:[%s1389_s1 + $0xe0] sm:$0xff]   ;;  %v1044_v21 = vld [vmem:[%s1389_s1 + $0xe8] sm:$0xff]  }
   0x7   :  { %v1037_v14 = vld [vmem:[%s1389_s1 + $0x18] sm:$0xff]   ;;  %v1041_v18 = vld [vmem:[%s1389_s1 + $0x20] sm:$0xff]   ;;  %v1045_v22 = vld [vmem:[%s1389_s1 + $0x28] sm:$0xff]  }
   0x8   :  { %922 = vmatpush3.bf16.msra.mxu0 %v1029_v6  ;;  %v1038_v15 = vld [vmem:[%s1389_s1 + $0x98] sm:$0xff]   ;;  %v1042_v19 = vld [vmem:[%s1389_s1 + $0xa0] sm:$0xff]   ;;  %v1046_v23 = vld [vmem:[%s1389_s1 + $0xa8] sm:$0xff]  }
   0x9   :  { %944 = vmatpush3.bf16.msra.mxu1 %v1030_v7  ;;  %923 = vmatprep.subr.bf16.mxu0 %v1031_v8  ;;  %v1047_v24 = vld [vmem:[%s1389_s1 + $0x70] sm:$0xff]   ;;  %v1051_v28 = vld [vmem:[%s1389_s1 + $0x78] sm:$0xff]   ;;  %v22_v32 = vld [vmem:[%s1388_s0] sm:$0xff] }
   0xa   :  { %945 = vmatprep.subr.bf16.mxu1 %v1032_v9  ;;  %v1048_v25 = vld [vmem:[%s1389_s1 + $0xf0] sm:$0xff]   ;;  %v1052_v29 = vld [vmem:[%s1389_s1 + $0xf8] sm:$0xff]   ;;  %v26_v33 = vld [vmem:[%s1388_s0 + $0x20] sm:$0xff] }
   0xb   :  { %v1049_v26 = vld [vmem:[%s1389_s1 + $0x30] sm:$0xff]   ;;  %v1053_v30 = vld [vmem:[%s1389_s1 + $0x38] sm:$0xff]   ;;  %v23_v34 = vld [vmem:[%s1388_s0 + $0x8] sm:$0xff]  ;;  %v843_v35 = vcombine.low %v22_v32, %v26_v33  ;;  %v844_v36 = vcombine.high %v22_v32, %v26_v33 }
   0xc   :  { %924 = vmatpush3.bf16.msra.mxu0 %v1033_v10  ;;  %v1050_v27 = vld [vmem:[%s1389_s1 + $0xb0] sm:$0xff]   ;;  %v1054_v31 = vld [vmem:[%s1389_s1 + $0xb8] sm:$0xff]   ;;  %v27_v37 = vld [vmem:[%s1388_s0 + $0x28] sm:$0xff] }
   0xd   :  { %946 = vmatpush3.bf16.msra.mxu1 %v1034_v11  ;;  %925 = vmatprep.subr.bf16.mxu0 %v1035_v12  ;;  %v845_v38 = vcombine.low %v23_v34, %v27_v37  ;;  %v846_v39 = vcombine.high %v23_v34, %v27_v37  ;;  %v1055_v40 = vld [vmem:[%s1389_s1 + $0x140] sm:$0xff]   ;;  %v1059_v44 = vld [vmem:[%s1389_s1 + $0x148] sm:$0xff]   ;;  %v1063_v48 = vld [vmem:[%s1389_s1 + $0x150] sm:$0xff]  }
   0xe   :  { %947 = vmatprep.subr.bf16.mxu1 %v1036_v13  ;;  %621 = vmatprep.mubr.bf16.mxu0 %v844_v36  ;;  %v1056_v41 = vld [vmem:[%s1389_s1 + $0x1c0] sm:$0xff]   ;;  %v1060_v45 = vld [vmem:[%s1389_s1 + $0x1c8] sm:$0xff]   ;;  %v1064_v49 = vld [vmem:[%s1389_s1 + $0x1d0] sm:$0xff]  }
   0xf   :  { %662 = vmatprep.mubr.bf16.mxu1 %v846_v39  ;;  %v1057_v42 = vld [vmem:[%s1389_s1 + $0x100] sm:$0xff]   ;;  %v1061_v46 = vld [vmem:[%s1389_s1 + $0x108] sm:$0xff]   ;;  %v1065_v50 = vld [vmem:[%s1389_s1 + $0x110] sm:$0xff]  }
  0x10   :  { %926 = vmatpush3.bf16.msra.mxu0 %v1037_v14  ;;  %v1058_v43 = vld [vmem:[%s1389_s1 + $0x180] sm:$0xff]   ;;  %v1062_v47 = vld [vmem:[%s1389_s1 + $0x188] sm:$0xff]   ;;  %v1066_v51 = vld [vmem:[%s1389_s1 + $0x190] sm:$0xff]  }
  0x11   :  { %948 = vmatpush3.bf16.msra.mxu1 %v1038_v15  ;;  %927 = vmatprep.subr.bf16.mxu0 %v1039_v16  ;;  %v1067_v52 = vld [vmem:[%s1389_s1 + $0x158] sm:$0xff]   ;;  %v1071_v56 = vld [vmem:[%s1389_s1 + $0x160] sm:$0xff]   ;;  %v1075_v60 = vld [vmem:[%s1389_s1 + $0x168] sm:$0xff]  }
  0x12   :  { %949 = vmatprep.subr.bf16.mxu1 %v1040_v17  ;;  %v1068_v53 = vld [vmem:[%s1389_s1 + $0x1d8] sm:$0xff]   ;;  %v1072_v57 = vld [vmem:[%s1389_s1 + $0x1e0] sm:$0xff]   ;;  %v1076_v61 = vld [vmem:[%s1389_s1 + $0x1e8] sm:$0xff]  }
  0x13   :  { %v1069_v54 = vld [vmem:[%s1389_s1 + $0x118] sm:$0xff]   ;;  %v1073_v58 = vld [vmem:[%s1389_s1 + $0x120] sm:$0xff]   ;;  %v1077_v62 = vld [vmem:[%s1389_s1 + $0x128] sm:$0xff]  }
  0x14   :  { %928 = vmatpush3.bf16.msra.mxu0 %v1041_v18  ;;  %v1070_v55 = vld [vmem:[%s1389_s1 + $0x198] sm:$0xff]   ;;  %v1074_v59 = vld [vmem:[%s1389_s1 + $0x1a0] sm:$0xff]   ;;  %v1078_v63 = vld [vmem:[%s1389_s1 + $0x1a8] sm:$0xff]  }
  0x15   :  { %950 = vmatpush3.bf16.msra.mxu1 %v1042_v19  ;;  %929 = vmatprep.subr.bf16.mxu0 %v1043_v20  ;;  %v1079_v0 = vld [vmem:[%s1389_s1 + $0x170] sm:$0xff]   ;;  %v1083_v4 = vld [vmem:[%s1389_s1 + $0x178] sm:$0xff]  }
  0x16   :  { %951 = vmatprep.subr.bf16.mxu1 %v1044_v21  ;;  %v1080_v1 = vld [vmem:[%s1389_s1 + $0x1f0] sm:$0xff]   ;;  %v1084_v5 = vld [vmem:[%s1389_s1 + $0x1f8] sm:$0xff]  }
  0x17   :  { %v1081_v2 = vld [vmem:[%s1389_s1 + $0x130] sm:$0xff]   ;;  %v1085_v6 = vld [vmem:[%s1389_s1 + $0x138] sm:$0xff]  }
  0x18   :  { %930 = vmatpush3.bf16.msra.mxu0 %v1045_v22  ;;  %v1082_v3 = vld [vmem:[%s1389_s1 + $0x1b0] sm:$0xff]   ;;  %v1086_v7 = vld [vmem:[%s1389_s1 + $0x1b8] sm:$0xff]  }
  0x19   :  { %952 = vmatpush3.bf16.msra.mxu1 %v1046_v23  ;;  %931 = vmatprep.subr.bf16.mxu0 %v1047_v24  ;;  %v24_v8 = vld [vmem:[%s1388_s0 + $0x10] sm:$0xff]  ;;  %v25_v12 = vld [vmem:[%s1388_s0 + $0x18] sm:$0xff] }
  0x1a   :  { %953 = vmatprep.subr.bf16.mxu1 %v1048_v25  ;;  %v28_v9 = vld [vmem:[%s1388_s0 + $0x30] sm:$0xff]  ;;  %v29_v13 = vld [vmem:[%s1388_s0 + $0x38] sm:$0xff] }
  0x1b   :  { %v847_v10 = vcombine.low %v24_v8, %v28_v9  ;;  %v848_v11 = vcombine.high %v24_v8, %v28_v9  ;;  %v849_v14 = vcombine.low %v25_v12, %v29_v13  ;;  %v850_v15 = vcombine.high %v25_v12, %v29_v13 }
  0x1c   :  { %932 = vmatpush3.bf16.msra.mxu0 %v1049_v26 }
  0x1d   :  { %954 = vmatpush3.bf16.msra.mxu1 %v1050_v27  ;;  %933 = vmatprep.subr.bf16.mxu0 %v1051_v28 }
  0x1e   :  { %955 = vmatprep.subr.bf16.mxu1 %v1052_v29 }
  0x20   :  { %934 = vmatpush3.bf16.msra.mxu0 %v1053_v30 }
  0x21   :  { %956 = vmatpush3.bf16.msra.mxu1 %v1054_v31  ;;  %963 = vmatprep.subr.bf16.mxu0 %v1055_v40 }
  0x22   :  { %985 = vmatprep.subr.bf16.mxu1 %v1056_v41 }
  0x23   :  { %622 = vmatmul.mubr.bf16.vlgmr.msra.gmra.mrb[0].mxu0 %v843_v35 }
  0x24   :  { %663 = vmatmul.mubr.bf16.vlgmr.msra.gmra.mrb[0].mxu1 %v845_v38  ;;  %964 = vmatpush3.bf16.msra.mxu0 %v1057_v42 }
  0x25   :  { %986 = vmatpush3.bf16.msra.mxu1 %v1058_v43  ;;  %965 = vmatprep.subr.bf16.mxu0 %v1059_v44 }
  0x26   :  { %987 = vmatprep.subr.bf16.mxu1 %v1060_v45  ;;  %703 = vmatprep.mubr.bf16.mxu0 %v848_v11 }
  0x28   :  { %966 = vmatpush3.bf16.msra.mxu0 %v1061_v46 }
  0x29   :  { %988 = vmatpush3.bf16.msra.mxu1 %v1062_v47  ;;  %967 = vmatprep.subr.bf16.mxu0 %v1063_v48 }
  0x2a   :  { %989 = vmatprep.subr.bf16.mxu1 %v1064_v49 }
  0x2c   :  { %968 = vmatpush3.bf16.msra.mxu0 %v1065_v50 }
  0x2d   :  { %990 = vmatpush3.bf16.msra.mxu1 %v1066_v51  ;;  %969 = vmatprep.subr.bf16.mxu0 %v1067_v52 }
  0x2e   :  { %991 = vmatprep.subr.bf16.mxu1 %v1068_v53 }
  0x30   :  { %970 = vmatpush3.bf16.msra.mxu0 %v1069_v54 }
  0x31   :  { %992 = vmatpush3.bf16.msra.mxu1 %v1070_v55  ;;  %971 = vmatprep.subr.bf16.mxu0 %v1071_v56 }
  0x32   :  { %993 = vmatprep.subr.bf16.mxu1 %v1072_v57 }
  0x34   :  { %972 = vmatpush3.bf16.msra.mxu0 %v1073_v58 }
  0x35   :  { %994 = vmatpush3.bf16.msra.mxu1 %v1074_v59  ;;  %973 = vmatprep.subr.bf16.mxu0 %v1075_v60 }
  0x36   :  { %995 = vmatprep.subr.bf16.mxu1 %v1076_v61 }
  0x38   :  { %974 = vmatpush3.bf16.msra.mxu0 %v1077_v62 }
  0x39   :  { %996 = vmatpush3.bf16.msra.mxu1 %v1078_v63  ;;  %975 = vmatprep.subr.bf16.mxu0 %v1079_v0 }
  0x3a   :  { %997 = vmatprep.subr.bf16.mxu1 %v1080_v1 }
  0x3c   :  { %976 = vmatpush3.bf16.msra.mxu0 %v1081_v2 }
  0x3d   :  { %998 = vmatpush3.bf16.msra.mxu1 %v1082_v3  ;;  %977 = vmatprep.subr.bf16.mxu0 %v1083_v4 }
  0x3e   :  { %999 = vmatprep.subr.bf16.mxu1 %v1084_v5 }
  0x40   :  { %978 = vmatpush3.bf16.msra.mxu0 %v1085_v6 }
  0x41   :  { %1000 = vmatpush3.bf16.msra.mxu1 %v1086_v7 }
  0x42   :  { %10 = vsyncpa [#allocation3], 0  ;;  %744 = vmatprep.mubr.bf16.mxu1 %v850_v15  ;;  %v1087_v16 = vld [vmem:[%s1391_s3] sm:$0xff]   ;;  %v1113_v17 = vmov 0.0   ;;  %v1088_v18 = vld [vmem:[%s1391_s3 + $0x8] sm:$0xff]   ;;  %vm1114_vm0 = vmmov 0  }
  0x43   :  { %704 = vmatmul.mubr.bf16.vlgmr.msra.gmra.mrb[4].mxu0 %v847_v10  ;;  %1010 = vmatprep.subr.bf16.mxu0 %v1113_v17  ;;  %v842_v21 = vld [vmem:[%s1390_s2] ss:$0 sm:$0xff]  ;;  %vm779_vm1 = vcmask 261120   ;;  %s1115_s16 = smov [#allocation2]  }
  0x44   :  { %745 = vmatmul.mubr.bf16.vlgmr.msra.gmra.mrb[4].mxu1 %v849_v14  ;;  %1011 = vmatpush3.bf16.msra.mxu0 %v1087_v16  ;;  %v915_v55 = vld [vmem:[%s1392_s4] ss:$0 sm:$0xff]  ;;  %s831_s17 = sshll.u32 %s1115_s16, 4  ;;  %s832_s17 = int_to_ptr.vmem [resolvable:$true] %s831_s17 }
  0x45   :  { %1012 = vmatprep.subr.bf16.mxu0 %v1113_v17  ;;  %1014 = vmatprep.mubr.msk.bf16.mxu0 %vm1114_vm0, %v1113_v17  ;;  %s1089_s18 = scalar_lea.vmem %s832_s17, 256  ;;  %p1094_p1 = scmp.lt.s32.totalorder %s832_s17, %s832_s17 }
  0x46   :  { %p1090_p0 = scmp.ne.s32.totalorder %s832_s17, %s1089_s18  ;;  %p1095_p2 = scmp.lt.s32.totalorder %s1089_s18, %s1089_s18 }
  0x48   :  { %1013 = vmatpush3.bf16.msra.mxu0 %v1088_v18  ;;  %p1096_p3 = por %p1095_p2, %p1094_p1 }
  0x4a   :  { %p1097_p4 = pnand %p1096_p3, %p1090_p0 }
  0xf6   :  { %v935_v19 = vpop.f32.mrb[0].mxu0 }
  0xf7   :  { %v957_v20 = vpop.f32.mrb[0].mxu1  ;;  %v936_v22 = vpop.f32.mrb[1].mxu0 }
  0xf8   :  { %v937_v23 = vadd.f32 %v936_v22, %v935_v19  ;;  %v958_v24 = vpop.f32.mrb[1].mxu1  ;;  %v938_v25 = vpop.f32.mrb[2].mxu0 }
  0xf9   :  { %v959_v26 = vadd.f32 %v958_v24, %v957_v20  ;;  %v960_v27 = vpop.f32.mrb[2].mxu1  ;;  %v939_v28 = vpop.f32.mrb[3].mxu0 }
  0xfa   :  { %v624_v29 = vadd.f32 %v937_v23, %v842_v21  ;;  %v940_v30 = vadd.f32 %v939_v28, %v938_v25  ;;  %v961_v31 = vpop.f32.mrb[3].mxu1 }
  0xfb   :  { %v962_v32 = vadd.f32 %v961_v31, %v960_v27 }
  0xfc   :  { %v665_v33 = vadd.f32 %v959_v26, %v624_v29  ;;  %v627_v34 = vadd.f32 %v940_v30, %v842_v21 }
  0xfe   :  { %v668_v35 = vadd.f32 %v962_v32, %v627_v34 }
 0x116   :  { %v979_v36 = vpop.f32.mrb[4].mxu0 }
 0x117   :  { %v1001_v37 = vpop.f32.mrb[4].mxu1  ;;  %v980_v38 = vpop.f32.mrb[5].mxu0 }
 0x118   :  { %v981_v39 = vadd.f32 %v980_v38, %v979_v36  ;;  %v1002_v40 = vpop.f32.mrb[5].mxu1  ;;  %v982_v41 = vpop.f32.mrb[6].mxu0 }
 0x119   :  { %v1003_v42 = vadd.f32 %v1002_v40, %v1001_v37  ;;  %v1004_v43 = vpop.f32.mrb[6].mxu1  ;;  %v983_v44 = vpop.f32.mrb[7].mxu0 }
 0x11a   :  { %v706_v45 = vadd.f32 %v981_v39, %v665_v33  ;;  %v984_v46 = vadd.f32 %v983_v44, %v982_v41  ;;  %v1005_v47 = vpop.f32.mrb[7].mxu1 }
 0x11b   :  { %v1006_v48 = vadd.f32 %v1005_v47, %v1004_v43 }
 0x11c   :  { %v747_v49 = vadd.f32 %v1003_v42, %v706_v45  ;;  %v709_v50 = vadd.f32 %v984_v46, %v668_v35 }
 0x11e   :  { %v750_v51 = vadd.f32 %v1006_v48, %v709_v50  ;;  %v753_v52 = vmax.f32 %v747_v49, 0.0 }
 0x120   :  { %v754_v53 = vmax.f32 %v750_v51, 0.0 }
 0x122   :  { %v755_v54 = vpack.c.bf16 %v754_v53, %v753_v52 }
 0x124   :  { %1015 = vmatmul.mubr.msk.bf16.vlgmr.msra.gmra.mrb[8].mxu0 %vm779_vm1, %v755_v54 }
 0x1f7   :  { %v817_v56 = vpop.f32.mrb[8].mxu0 }
 0x1f8   :  { %v818_v57 = vadd.f32 %v915_v55, %v817_v56  ;;  %v1016_v58 = vpop.f32.mrb[9].mxu0 }
 0x1f9   :  { %v820_v59 = vpop.f32.mrb[10].mxu0 }
 0x1fa   :  { %824 = vst [vmem:[#allocation2] sm:$0xff] %v818_v57  ;;  %v821_v60 = vadd.f32 %v915_v55, %v820_v59  ;;  %v1017_v61 = vpop.f32.mrb[11].mxu0 }
 0x1fc   :  { %825 = vst [vmem:[#allocation2 + $0x8] sm:$0xff] %v821_v60 }
 0x1fd   :  { %1100 = shalt.err (!%p1097_p4)
}
 0x1fe   :  { %s1101_s20 = scalar_lea.hbm %s1393_s5, 256 }
 0x1ff   :  { %p1102_p5 = scmp.ne.s32.totalorder %s1393_s5, %s1101_s20  ;;  %p1105_p6 = scmp.lt.u32.totalorder %s1101_s20, %s1393_s5 }
 0x201   :  { %p1107_p7 = pnand %p1105_p6, %p1102_p5 }
 0x203   :  { %1110 = shalt.err (!%p1107_p7)
}
 0x204   :  { %s1116_s25 = smov 128   ;;  %s1117_s26 = smov 8  }
 0x205   :  { %837 = dma.vmem_to_hbm [thread:$0]  %s832_s17, 256, %s1393_s5, [#allocation3], %s1116_s25, %s1116_s25, %s1117_s26  }
 0x206   :  { %1111 = dma.done.wait [#allocation3], 256  }
 0x207   :  { %1112 = vsyncadd [#allocation3], 4294967040 }
 0x208   :  { %841 = vsyncpa [#allocation3], 1 }

</bundles_post_ra>
